<compile_context>
chip_gen: v6e
topology: v6e:2x2x1
jax: 0.10.0
libtpu: 0.0.40
codegen_flags: <defaults>
</compile_context>

<pallas_src>
import functools
import math

import jax
import jax.numpy as jnp
from jax.experimental import pallas as pl
from jax.experimental.pallas import tpu as pltpu


# ----------------------------- Pallas kernels -------------------------------


def _sht_shconv_kernel(x_ref, yinv_ref, wdeg_ref, wimp_ref, amat_ref, acc_ref, *, B, L):
    """Grid over V-tiles (reduction axis).

    Accumulates the SHT coefficients coeffs = (x*area) @ Y_inv for all batch
    samples at once ((B*Cin, tV) @ (tV, K) per step); on the last step runs the
    spectral conv as per-degree MXU matmuls and packs the result together with
    a block-diagonal copy of the impulse (1x1 conv) weights into a single
    fused "synthesis" matrix A of shape (B*Cout, K + B*Cin).
    """
    vi = pl.program_id(0)

    @pl.when(vi == 0)
    def _():
        acc_ref[...] = jnp.zeros_like(acc_ref)

    # SHT (analysis), batch folded into the row dim.
    acc_ref[...] += jnp.dot(x_ref[...], yinv_ref[...],
                            preferred_element_type=jnp.float32)

    @pl.when(vi == pl.num_programs(0) - 1)
    def _():
        coeffs = acc_ref[...]                          # (B*Cin, K) f32
        cin = coeffs.shape[0] // B
        cout = wimp_ref.shape[0]
        wimp = wimp_ref[...]                           # (Cout, Cin) f32
        zblk = jnp.zeros((cout, cin), jnp.float32)

        rows = []
        for b in range(B):                             # static, B is small
            c_b = coeffs[b * cin:(b + 1) * cin, :]     # (Cin, K)
            # SHConv: one small MXU matmul per degree l (weights shared across
            # the 2l+1 orders of each degree) -- no expanded weight tensor.
            sc_parts = []
            for l in range(L + 1):                     # static
                lo, hi = l * l, (l + 1) * (l + 1)
                sc_parts.append(jnp.dot(wdeg_ref[l], c_b[:, lo:hi],
                                        preferred_element_type=jnp.float32))
            sc_b = jnp.concatenate(sc_parts, axis=1)   # (Cout, K)
            # Append the impulse weights block-diagonally so that
            # A @ [Y ; x_flat] == ISHT(sc) + Conv1d_1x1(x) with the add fused
            # into MXU accumulation.
            imp = [wimp if bb == b else zblk for bb in range(B)]
            rows.append(jnp.concatenate([sc_b] + imp, axis=1))
        amat_ref[...] = jnp.concatenate(rows, axis=0).astype(amat_ref.dtype)


def _isht_impulse_kernel(amat_ref, y_ref, x_ref, out_ref, stats_ref, *, K):
    """Grid over V-tiles (parallel).

    y_pre = A_sc @ Y_tile + W_blk @ x_tile  (ISHT + impulse + add, all batch
    samples in one set of lane-dense matmuls), plus per-tile per-channel
    partial BatchNorm statistics (sum / sum of squares).
    """
    cdt = y_ref.dtype
    a = amat_ref[...]                                   # (B*Cout, K + B*Cin) f32
    a_sc = a[:, :K].astype(cdt)
    a_imp = a[:, K:].astype(cdt)
    y_pre = jnp.dot(a_sc, y_ref[...], preferred_element_type=jnp.float32)
    y_pre = y_pre + jnp.dot(a_imp, x_ref[...], preferred_element_type=jnp.float32)
    out_ref[...] = y_pre.astype(out_ref.dtype)

    s = jnp.sum(y_pre, axis=1, keepdims=True)           # (B*Cout, 1)
    ss = jnp.sum(y_pre * y_pre, axis=1, keepdims=True)  # (B*Cout, 1)
    stats_ref[0] = jnp.concatenate([s, ss], axis=1)     # (B*Cout, 2)


def _bn_apply_kernel(y_ref, scale_ref, shift_ref, out_ref):
    """Grid over V-tiles (parallel): per-channel affine normalize as a fused
    multiply-add (stats were already reduced from the per-tile partials)."""
    out_ref[...] = (y_ref[...] * scale_ref[...] + shift_ref[...]).astype(out_ref.dtype)


# ------------------------------- glue (JAX) ---------------------------------


def _per_degree_weights(w_sh, L, interval):
    """(Cout, Cin, num_L) anchor weights -> compact (Cout, Cin, L+1) per-degree
    weights. Exact for interval == 1."""
    num_L = w_sh.shape[-1]
    if interval == 1:
        return w_sh
    # TODO(synk): for interval > 1 verify this linear interpolation matches the
    # reference SHConv's degree-interpolation scheme exactly.
    degrees = jnp.arange(L + 1, dtype=jnp.float32)
    pos = degrees / float(interval)
    lo = jnp.clip(jnp.floor(pos).astype(jnp.int32), 0, num_L - 1)
    hi = jnp.clip(lo + 1, 0, num_L - 1)
    frac = jnp.clip(pos - lo.astype(jnp.float32), 0.0, 1.0)
    return w_sh[..., lo] * (1.0 - frac) + w_sh[..., hi] * frac


def _pick_v_tile(V):
    for t in (2048, 1024, 512, 256, 128):
        if V % t == 0:
            return t
    return V  # fall back to a single (untiled) block


@functools.partial(jax.jit, static_argnames=("L", "interval", "eps", "compute_dtype"))
def final_forward(x, area, Y, Y_inv, w_sh, w_imp, gamma, beta, *,
                  L, interval, eps=1e-5, compute_dtype=jnp.float32):
    B, Cin, V = x.shape
    Cout = w_imp.shape[0]
    K = (L + 1) ** 2
    assert Y.shape == (K, V) and Y_inv.shape == (V, K)

    tv = _pick_v_tile(V)
    nv = V // tv

    # One-time host-side preparation (constants across batch / V-tiles).
    w_deg = jnp.transpose(_per_degree_weights(w_sh, L, interval), (2, 0, 1))  # (L+1,Cout,Cin)
    yinv_s = (area[:, None] * Y_inv).astype(compute_dtype)   # fold vertex areas into Y_inv
    y_c = Y.astype(compute_dtype)
    x_flat = x.reshape(B * Cin, V).astype(compute_dtype)
    w_imp32 = w_imp.astype(jnp.float32)

    def cparams(sem):
        return pltpu.CompilerParams(dimension_semantics=(sem,),
                                    vmem_limit_bytes=32 * 1024 * 1024)

    # ---- kernel A: SHT (reduction over V) + per-degree SHConv ----
    amat = pl.pallas_call(
        functools.partial(_sht_shconv_kernel, B=B, L=L),
        out_shape=jax.ShapeDtypeStruct((B * Cout, K + B * Cin), jnp.float32),
        grid_spec=pltpu.PrefetchScalarGridSpec(
            num_scalar_prefetch=0,
            grid=(nv,),
            in_specs=[
                pl.BlockSpec((B * Cin, tv), lambda v: (0, v)),          # x (flattened batch)
                pl.BlockSpec((tv, K), lambda v: (v, 0)),                # area-folded Y_inv
                pl.BlockSpec((L + 1, Cout, Cin), lambda v: (0, 0, 0)),  # compact SH weights
                pl.BlockSpec((Cout, Cin), lambda v: (0, 0)),            # impulse weights
            ],
            out_specs=pl.BlockSpec((B * Cout, K + B * Cin), lambda v: (0, 0)),
            scratch_shapes=[pltpu.VMEM((B * Cin, K), jnp.float32)],
        ),
        compiler_params=cparams("arbitrary"),
    )(x_flat, yinv_s, w_deg, w_imp32)

    # ---- kernel B: fused ISHT + impulse + add, with partial BN stats ----
    y_pre, stats = pl.pallas_call(
        functools.partial(_isht_impulse_kernel, K=K),
        out_shape=(jax.ShapeDtypeStruct((B * Cout, V), jnp.float32),
                   jax.ShapeDtypeStruct((nv, B * Cout, 2), jnp.float32)),
        grid_spec=pltpu.PrefetchScalarGridSpec(
            num_scalar_prefetch=0,
            grid=(nv,),
            in_specs=[
                pl.BlockSpec((B * Cout, K + B * Cin), lambda v: (0, 0)),
                pl.BlockSpec((K, tv), lambda v: (0, v)),
                pl.BlockSpec((B * Cin, tv), lambda v: (0, v)),
            ],
            out_specs=[pl.BlockSpec((B * Cout, tv), lambda v: (0, v)),
                       pl.BlockSpec((1, B * Cout, 2), lambda v: (v, 0, 0))],
        ),
        compiler_params=cparams("parallel"),
    )(amat, y_c, x_flat)

    # ---- tiny per-channel stats reduction (XLA), PyTorch-style biased var ----
    totals = jnp.sum(stats, axis=0).reshape(B, Cout, 2).sum(axis=0)   # (Cout, 2)
    n = float(B * V)
    mean = totals[:, 0] / n
    var = jnp.maximum(totals[:, 1] / n - mean * mean, 0.0)
    rstd = jax.lax.rsqrt(var + eps)
    scale = gamma * rstd
    shift = beta - mean * scale
    scale_r = jnp.tile(scale, (B,)).reshape(B * Cout, 1).astype(jnp.float32)
    shift_r = jnp.tile(shift, (B,)).reshape(B * Cout, 1).astype(jnp.float32)

    # ---- kernel C: BatchNorm apply (fused multiply-add per V-tile) ----
    out_flat = pl.pallas_call(
        _bn_apply_kernel,
        out_shape=jax.ShapeDtypeStruct((B * Cout, V), jnp.float32),
        grid_spec=pltpu.PrefetchScalarGridSpec(
            num_scalar_prefetch=0,
            grid=(nv,),
            in_specs=[
                pl.BlockSpec((B * Cout, tv), lambda v: (0, v)),
                pl.BlockSpec((B * Cout, 1), lambda v: (0, 0)),
                pl.BlockSpec((B * Cout, 1), lambda v: (0, 0)),
            ],
            out_specs=pl.BlockSpec((B * Cout, tv), lambda v: (0, v)),
        ),
        compiler_params=cparams("parallel"),
    )(y_pre, scale_r, shift_r)

    return out_flat.reshape(B, Cout, V)


# --------------------------- pure-JAX reference -----------------------------


def final_reference(x, area, Y, Y_inv, w_sh, w_imp, gamma, beta, *, L, interval, eps=1e-5):
    hp = jax.lax.Precision.HIGHEST
    w_deg = _per_degree_weights(w_sh, L, interval)                  # (Cout, Cin, L+1)
    deg = jnp.concatenate(
        [jnp.full((2 * l + 1,), l, dtype=jnp.int32) for l in range(L + 1)])
    w_full = w_deg[..., deg]                                        # (Cout, Cin, K)
    coeffs = jnp.einsum("bcv,vk->bck", x * area[None, None, :], Y_inv, precision=hp)
    sc = jnp.einsum("bik,oik->bok", coeffs, w_full, precision=hp)
    x1 = jnp.einsum("bok,kv->bov", sc, Y, precision=hp)
    x2 = jnp.einsum("oi,biv->bov", w_imp, x, precision=hp)
    y = x1 + x2
    mean = y.mean(axis=(0, 2), keepdims=True)
    var = ((y - mean) ** 2).mean(axis=(0, 2), keepdims=True)
    return (y - mean) / jnp.sqrt(var + eps) * gamma[None, :, None] + beta[None, :, None]


# ---------------------------------- main -------------------------------------


if __name__ == "__main__":
    # Small, deterministic synthetic problem.
    B, in_ch, out_ch = 2, 4, 8
    V = 128                      # number of sphere vertices
    L = 3                        # harmonic bandwidth -> K = (L+1)^2 = 16
    interval = 1
    K = (L + 1) ** 2
    num_L = math.ceil((L + 1) / interval)

    key = jax.random.PRNGKey(0)
    ks = jax.random.split(key, 8)
    x = jax.random.normal(ks[0], (B, in_ch, V), dtype=jnp.float32)
    area = 0.5 + jax.random.uniform(ks[1], (V,), dtype=jnp.float32)          # positive areas
    # Synthetic harmonic bases (real ones would come from spharm_real).
    Y = jax.random.normal(ks[2], (K, V), dtype=jnp.float32) / jnp.sqrt(V)
    Y_inv = jax.random.normal(ks[3], (V, K), dtype=jnp.float32) / jnp.sqrt(V)
    w_sh = 0.2 * jax.random.normal(ks[4], (out_ch, in_ch, num_L), dtype=jnp.float32)
    w_imp = 0.2 * jax.random.normal(ks[5], (out_ch, in_ch), dtype=jnp.float32)
    gamma = 1.0 + 0.1 * jax.random.normal(ks[6], (out_ch,), dtype=jnp.float32)
    beta = 0.1 * jax.random.normal(ks[7], (out_ch,), dtype=jnp.float32)

    ref = final_reference(x, area, Y, Y_inv, w_sh, w_imp, gamma, beta,
                          L=L, interval=interval)

    # f32 path: check against the pure-JAX reference.
    out_f32 = final_forward(x, area, Y, Y_inv, w_sh, w_imp, gamma, beta,
                            L=L, interval=interval, eps=1e-5,
                            compute_dtype=jnp.float32)
    out_f32 = jax.block_until_ready(out_f32)
    assert out_f32.shape == (B, out_ch, V)
    assert jnp.allclose(out_f32, ref, atol=1e-2, rtol=1e-2), "f32 kernel mismatch"

    # bf16 basis-matmul path (MXU-native on v5e/v6e/v7x; f32 accumulate & BN).
    out_bf16 = final_forward(x, area, Y, Y_inv, w_sh, w_imp, gamma, beta,
                             L=L, interval=interval, eps=1e-5,
                             compute_dtype=jnp.bfloat16)
    out_bf16 = jax.block_until_ready(out_bf16)
    assert jnp.allclose(out_bf16, ref, atol=5e-2, rtol=5e-2), "bf16 kernel mismatch"

    print("KERNEL_OK")
</pallas_src>

<mosaic_0001>
module attributes {stable_mosaic.version = 11 : i64} {
  func.func @_isht_impulse_kernel(%arg0: i32, %arg1: memref<16x24xf32, #tpu.memory_space<vmem>>, %arg2: memref<16x128xf32, #tpu.memory_space<vmem>>, %arg3: memref<8x128xf32, #tpu.memory_space<vmem>>, %arg4: memref<16x128xf32, #tpu.memory_space<vmem>>, %arg5: memref<1x16x2xf32, #tpu.memory_space<vmem>>) attributes {dimension_semantics = [#tpu.dimension_semantics<parallel>], iteration_bounds = array<i64: 1>, scalar_prefetch = 0 : i64, scratch_operands = 0 : i64, tpu.core_type = #tpu.core_type<tc>, window_params = [{pipeline_mode = #tpu.pipeline_mode<synchronous>, transform_indices = @transform_0, window_bounds = array<i64: 16, 24>}, {transform_indices = @transform_1, window_bounds = array<i64: 16, 128>}, {transform_indices = @transform_2, window_bounds = array<i64: 8, 128>}, {transform_indices = @transform_3, window_bounds = array<i64: 16, 128>}, {transform_indices = @transform_4, window_bounds = array<i64: 1, 16, 2>}]} {
    %c0 = arith.constant 0 : index
    %c0_0 = arith.constant 0 : index
    %0 = vector.load %arg1[%c0, %c0_0] : memref<16x24xf32, #tpu.memory_space<vmem>>, vector<16x24xf32>
    %1 = vector.extract_strided_slice %0 {offsets = [0, 0], sizes = [16, 16], strides = [1, 1]} : vector<16x24xf32> to vector<16x16xf32>
    %2 = vector.extract_strided_slice %0 {offsets = [0, 16], sizes = [16, 8], strides = [1, 1]} : vector<16x24xf32> to vector<16x8xf32>
    %c0_1 = arith.constant 0 : index
    %c0_2 = arith.constant 0 : index
    %3 = vector.load %arg2[%c0_1, %c0_2] : memref<16x128xf32, #tpu.memory_space<vmem>>, vector<16x128xf32>
    %cst = arith.constant dense<0.000000e+00> : vector<16x128xf32>
    %4 = tpu.matmul %1, %3, %cst {dimension_numbers = #tpu.dot_dimension_numbers<[1], [0], [0], [1], [0, 0, 1, 1], [], []>} : vector<16x16xf32>, vector<16x128xf32>, vector<16x128xf32> -> vector<16x128xf32>
    %c0_3 = arith.constant 0 : index
    %c0_4 = arith.constant 0 : index
    %5 = vector.load %arg3[%c0_3, %c0_4] : memref<8x128xf32, #tpu.memory_space<vmem>>, vector<8x128xf32>
    %cst_5 = arith.constant dense<0.000000e+00> : vector<16x128xf32>
    %6 = tpu.matmul %2, %5, %cst_5 {dimension_numbers = #tpu.dot_dimension_numbers<[1], [0], [0], [1], [0, 0, 1, 1], [], []>} : vector<16x8xf32>, vector<8x128xf32>, vector<16x128xf32> -> vector<16x128xf32>
    %7 = arith.addf %4, %6 : vector<16x128xf32>
    %c0_6 = arith.constant 0 : index
    %c0_7 = arith.constant 0 : index
    %8 = vector.load %arg4[%c0_6, %c0_7] : memref<16x128xf32, #tpu.memory_space<vmem>>, vector<16x128xf32>
    tpu.vector_store %arg4[%c0_6, %c0_7], %7 {strides = array<i32>} : memref<16x128xf32, #tpu.memory_space<vmem>>, vector<16x128xf32>,
    %cst_8 = arith.constant dense<0.000000e+00> : vector<16xf32>
    %9 = vector.multi_reduction <add>, %7, %cst_8 [1] : vector<16x128xf32> to vector<16xf32>
    %10 = vector.shape_cast %9 : vector<16xf32> to vector<16x1xf32>
    %11 = arith.mulf %7, %7 : vector<16x128xf32>
    %cst_9 = arith.constant dense<0.000000e+00> : vector<16xf32>
    %12 = vector.multi_reduction <add>, %11, %cst_9 [1] : vector<16x128xf32> to vector<16xf32>
    %13 = vector.shape_cast %12 : vector<16xf32> to vector<16x1xf32>
    %14 = tpu.concatenate %10, %13 in 1 : vector<16x1xf32>, vector<16x1xf32> -> vector<16x2xf32>
    %c0_10 = arith.constant 0 : index
    %c0_11 = arith.constant 0 : index
    %c0_12 = arith.constant 0 : index
    %15 = vector.load %arg5[%c0_10, %c0_11, %c0_12] : memref<1x16x2xf32, #tpu.memory_space<vmem>>, vector<1x16x2xf32>
    %16 = vector.shape_cast %15 : vector<1x16x2xf32> to vector<16x2xf32>
    %17 = vector.shape_cast %14 : vector<16x2xf32> to vector<1x16x2xf32>
    tpu.vector_store %arg5[%c0_10, %c0_11, %c0_12], %17 {strides = array<i32>} : memref<1x16x2xf32, #tpu.memory_space<vmem>>, vector<1x16x2xf32>,
    return
  }
  func.func @transform_0(%arg0: i32) -> (i32, i32) {
    %c0_i32 = arith.constant 0 : i32
    %c0_i32_0 = arith.constant 0 : i32
    %c0_i32_1 = arith.constant 0 : i32
    return %c0_i32, %c0_i32_0 : i32, i32
  }
  func.func @transform_1(%arg0: i32) -> (i32, i32) {
    %c0_i32 = arith.constant 0 : i32
    %c0_i32_0 = arith.constant 0 : i32
    return %c0_i32, %arg0 : i32, i32
  }
  func.func @transform_2(%arg0: i32) -> (i32, i32) {
    %c0_i32 = arith.constant 0 : i32
    %c0_i32_0 = arith.constant 0 : i32
    return %c0_i32, %arg0 : i32, i32
  }
  func.func @transform_3(%arg0: i32) -> (i32, i32) {
    %c0_i32 = arith.constant 0 : i32
    %c0_i32_0 = arith.constant 0 : i32
    return %c0_i32, %arg0 : i32, i32
  }
  func.func @transform_4(%arg0: i32) -> (i32, i32, i32) {
    %c0_i32 = arith.constant 0 : i32
    %c0_i32_0 = arith.constant 0 : i32
    %c0_i32_1 = arith.constant 0 : i32
    return %arg0, %c0_i32, %c0_i32_0 : i32, i32, i32
  }
}

module attributes {stable_mosaic.version = 11 : i64} {
  func.func @_sht_shconv_kernel(%arg0: i32, %arg1: memref<8x128xf32, #tpu.memory_space<vmem>>, %arg2: memref<128x16xf32, #tpu.memory_space<vmem>>, %arg3: memref<4x8x4xf32, #tpu.memory_space<vmem>>, %arg4: memref<8x4xf32, #tpu.memory_space<vmem>>, %arg5: memref<16x24xf32, #tpu.memory_space<vmem>>, %arg6: memref<8x16xf32, #tpu.memory_space<vmem>>) attributes {dimension_semantics = [#tpu.dimension_semantics<arbitrary>], iteration_bounds = array<i64: 1>, scalar_prefetch = 0 : i64, scratch_operands = 1 : i64, tpu.core_type = #tpu.core_type<tc>, window_params = [{transform_indices = @transform_0, window_bounds = array<i64: 8, 128>}, {transform_indices = @transform_1, window_bounds = array<i64: 128, 16>}, {pipeline_mode = #tpu.pipeline_mode<synchronous>, transform_indices = @transform_2, window_bounds = array<i64: 4, 8, 4>}, {pipeline_mode = #tpu.pipeline_mode<synchronous>, transform_indices = @transform_3, window_bounds = array<i64: 8, 4>}, {pipeline_mode = #tpu.pipeline_mode<synchronous>, transform_indices = @transform_4, window_bounds = array<i64: 16, 24>}]} {
    %c0_i32 = arith.constant 0 : i32
    %0 = arith.cmpi eq, %arg0, %c0_i32 : i32
    %1 = arith.extui %0 : i1 to i32
    %c0_i32_0 = arith.constant 0 : i32
    %2 = arith.cmpi ne, %1, %c0_i32_0 : i32
    scf.if %2 {
      %cst_10 = arith.constant 0.000000e+00 : f32
      %12 = vector.broadcast %cst_10 : f32 to vector<8x16xf32>
      %c0_11 = arith.constant 0 : index
      %c0_12 = arith.constant 0 : index
      %13 = vector.load %arg6[%c0_11, %c0_12] : memref<8x16xf32, #tpu.memory_space<vmem>>, vector<8x16xf32>
      tpu.vector_store %arg6[%c0_11, %c0_12], %12 {strides = array<i32>} : memref<8x16xf32, #tpu.memory_space<vmem>>, vector<8x16xf32>,
    } else {
    }
    %c0 = arith.constant 0 : index
    %c0_1 = arith.constant 0 : index
    %3 = vector.load %arg6[%c0, %c0_1] : memref<8x16xf32, #tpu.memory_space<vmem>>, vector<8x16xf32>
    %c0_2 = arith.constant 0 : index
    %c0_3 = arith.constant 0 : index
    %4 = vector.load %arg1[%c0_2, %c0_3] : memref<8x128xf32, #tpu.memory_space<vmem>>, vector<8x128xf32>
    %c0_4 = arith.constant 0 : index
    %c0_5 = arith.constant 0 : index
    %5 = vector.load %arg2[%c0_4, %c0_5] : memref<128x16xf32, #tpu.memory_space<vmem>>, vector<128x16xf32>
    %cst = arith.constant dense<0.000000e+00> : vector<8x16xf32>
    %6 = tpu.matmul %4, %5, %cst {dimension_numbers = #tpu.dot_dimension_numbers<[1], [0], [0], [1], [0, 0, 1, 1], [], []>} : vector<8x128xf32>, vector<128x16xf32>, vector<8x16xf32> -> vector<8x16xf32>
    %7 = arith.addf %3, %6 : vector<8x16xf32>
    %c0_6 = arith.constant 0 : index
    %c0_7 = arith.constant 0 : index
    %8 = vector.load %arg6[%c0_6, %c0_7] : memref<8x16xf32, #tpu.memory_space<vmem>>, vector<8x16xf32>
    tpu.vector_store %arg6[%c0_6, %c0_7], %7 {strides = array<i32>} : memref<8x16xf32, #tpu.memory_space<vmem>>, vector<8x16xf32>,
    %c0_i32_8 = arith.constant 0 : i32
    %9 = arith.cmpi eq, %arg0, %c0_i32_8 : i32
    %10 = arith.extui %9 : i1 to i32
    %c0_i32_9 = arith.constant 0 : i32
    %11 = arith.cmpi ne, %10, %c0_i32_9 : i32
    scf.if %11 {
      %c0_10 = arith.constant 0 : index
      %c0_11 = arith.constant 0 : index
      %12 = vector.load %arg6[%c0_10, %c0_11] : memref<8x16xf32, #tpu.memory_space<vmem>>, vector<8x16xf32>
      %c0_12 = arith.constant 0 : index
      %c0_13 = arith.constant 0 : index
      %13 = vector.load %arg4[%c0_12, %c0_13] : memref<8x4xf32, #tpu.memory_space<vmem>>, vector<8x4xf32>
      %cst_14 = arith.constant 0.000000e+00 : f32
      %14 = vector.broadcast %cst_14 : f32 to vector<8x4xf32>
      %15 = vector.extract_strided_slice %12 {offsets = [0, 0], sizes = [4, 16], strides = [1, 1]} : vector<8x16xf32> to vector<4x16xf32>
      %c0_15 = arith.constant 0 : index
      %c0_16 = arith.constant 0 : index
      %c0_17 = arith.constant 0 : index
      %16 = vector.load %arg3[%c0_15, %c0_16, %c0_17] : memref<4x8x4xf32, #tpu.memory_space<vmem>>, vector<1x8x4xf32>
      %17 = vector.shape_cast %16 : vector<1x8x4xf32> to vector<8x4xf32>
      %18 = vector.extract_strided_slice %15 {offsets = [0, 0], sizes = [4, 1], strides = [1, 1]} : vector<4x16xf32> to vector<4x1xf32>
      %cst_18 = arith.constant dense<0.000000e+00> : vector<8x1xf32>
      %19 = tpu.matmul %17, %18, %cst_18 {dimension_numbers = #tpu.dot_dimension_numbers<[1], [0], [0], [1], [0, 0, 1, 1], [], []>} : vector<8x4xf32>, vector<4x1xf32>, vector<8x1xf32> -> vector<8x1xf32>
      %c1 = arith.constant 1 : index
      %c0_19 = arith.constant 0 : index
      %c0_20 = arith.constant 0 : index
      %20 = vector.load %arg3[%c1, %c0_19, %c0_20] : memref<4x8x4xf32, #tpu.memory_space<vmem>>, vector<1x8x4xf32>
      %21 = vector.shape_cast %20 : vector<1x8x4xf32> to vector<8x4xf32>
      %22 = vector.extract_strided_slice %15 {offsets = [0, 1], sizes = [4, 3], strides = [1, 1]} : vector<4x16xf32> to vector<4x3xf32>
      %cst_21 = arith.constant dense<0.000000e+00> : vector<8x3xf32>
      %23 = tpu.matmul %21, %22, %cst_21 {dimension_numbers = #tpu.dot_dimension_numbers<[1], [0], [0], [1], [0, 0, 1, 1], [], []>} : vector<8x4xf32>, vector<4x3xf32>, vector<8x3xf32> -> vector<8x3xf32>
      %c2 = arith.constant 2 : index
      %c0_22 = arith.constant 0 : index
      %c0_23 = arith.constant 0 : index
      %24 = vector.load %arg3[%c2, %c0_22, %c0_23] : memref<4x8x4xf32, #tpu.memory_space<vmem>>, vector<1x8x4xf32>
      %25 = vector.shape_cast %24 : vector<1x8x4xf32> to vector<8x4xf32>
      %26 = vector.extract_strided_slice %15 {offsets = [0, 4], sizes = [4, 5], strides = [1, 1]} : vector<4x16xf32> to vector<4x5xf32>
      %cst_24 = arith.constant dense<0.000000e+00> : vector<8x5xf32>
      %27 = tpu.matmul %25, %26, %cst_24 {dimension_numbers = #tpu.dot_dimension_numbers<[1], [0], [0], [1], [0, 0, 1, 1], [], []>} : vector<8x4xf32>, vector<4x5xf32>, vector<8x5xf32> -> vector<8x5xf32>
      %c3 = arith.constant 3 : index
      %c0_25 = arith.constant 0 : index
      %c0_26 = arith.constant 0 : index
      %28 = vector.load %arg3[%c3, %c0_25, %c0_26] : memref<4x8x4xf32, #tpu.memory_space<vmem>>, vector<1x8x4xf32>
      %29 = vector.shape_cast %28 : vector<1x8x4xf32> to vector<8x4xf32>
      %30 = vector.extract_strided_slice %15 {offsets = [0, 9], sizes = [4, 7], strides = [1, 1]} : vector<4x16xf32> to vector<4x7xf32>
      %cst_27 = arith.constant dense<0.000000e+00> : vector<8x7xf32>
      %31 = tpu.matmul %29, %30, %cst_27 {dimension_numbers = #tpu.dot_dimension_numbers<[1], [0], [0], [1], [0, 0, 1, 1], [], []>} : vector<8x4xf32>, vector<4x7xf32>, vector<8x7xf32> -> vector<8x7xf32>
      %32 = tpu.concatenate %19, %23, %27, %31 in 1 : vector<8x1xf32>, vector<8x3xf32>, vector<8x5xf32>, vector<8x7xf32> -> vector<8x16xf32>
      %33 = tpu.concatenate %32, %13, %14 in 1 : vector<8x16xf32>, vector<8x4xf32>, vector<8x4xf32> -> vector<8x24xf32>
      %34 = vector.extract_strided_slice %12 {offsets = [4, 0], sizes = [4, 16], strides = [1, 1]} : vector<8x16xf32> to vector<4x16xf32>
      %c0_28 = arith.constant 0 : index
      %c0_29 = arith.constant 0 : index
      %c0_30 = arith.constant 0 : index
      %35 = vector.load %arg3[%c0_28, %c0_29, %c0_30] : memref<4x8x4xf32, #tpu.memory_space<vmem>>, vector<1x8x4xf32>
      %36 = vector.shape_cast %35 : vector<1x8x4xf32> to vector<8x4xf32>
      %37 = vector.extract_strided_slice %34 {offsets = [0, 0], sizes = [4, 1], strides = [1, 1]} : vector<4x16xf32> to vector<4x1xf32>
      %cst_31 = arith.constant dense<0.000000e+00> : vector<8x1xf32>
      %38 = tpu.matmul %36, %37, %cst_31 {dimension_numbers = #tpu.dot_dimension_numbers<[1], [0], [0], [1], [0, 0, 1, 1], [], []>} : vector<8x4xf32>, vector<4x1xf32>, vector<8x1xf32> -> vector<8x1xf32>
      %c1_32 = arith.constant 1 : index
      %c0_33 = arith.constant 0 : index
      %c0_34 = arith.constant 0 : index
      %39 = vector.load %arg3[%c1_32, %c0_33, %c0_34] : memref<4x8x4xf32, #tpu.memory_space<vmem>>, vector<1x8x4xf32>
      %40 = vector.shape_cast %39 : vector<1x8x4xf32> to vector<8x4xf32>
      %41 = vector.extract_strided_slice %34 {offsets = [0, 1], sizes = [4, 3], strides = [1, 1]} : vector<4x16xf32> to vector<4x3xf32>
      %cst_35 = arith.constant dense<0.000000e+00> : vector<8x3xf32>
      %42 = tpu.matmul %40, %41, %cst_35 {dimension_numbers = #tpu.dot_dimension_numbers<[1], [0], [0], [1], [0, 0, 1, 1], [], []>} : vector<8x4xf32>, vector<4x3xf32>, vector<8x3xf32> -> vector<8x3xf32>
      %c2_36 = arith.constant 2 : index
      %c0_37 = arith.constant 0 : index
      %c0_38 = arith.constant 0 : index
      %43 = vector.load %arg3[%c2_36, %c0_37, %c0_38] : memref<4x8x4xf32, #tpu.memory_space<vmem>>, vector<1x8x4xf32>
      %44 = vector.shape_cast %43 : vector<1x8x4xf32> to vector<8x4xf32>
      %45 = vector.extract_strided_slice %34 {offsets = [0, 4], sizes = [4, 5], strides = [1, 1]} : vector<4x16xf32> to vector<4x5xf32>
      %cst_39 = arith.constant dense<0.000000e+00> : vector<8x5xf32>
      %46 = tpu.matmul %44, %45, %cst_39 {dimension_numbers = #tpu.dot_dimension_numbers<[1], [0], [0], [1], [0, 0, 1, 1], [], []>} : vector<8x4xf32>, vector<4x5xf32>, vector<8x5xf32> -> vector<8x5xf32>
      %c3_40 = arith.constant 3 : index
      %c0_41 = arith.constant 0 : index
      %c0_42 = arith.constant 0 : index
      %47 = vector.load %arg3[%c3_40, %c0_41, %c0_42] : memref<4x8x4xf32, #tpu.memory_space<vmem>>, vector<1x8x4xf32>
      %48 = vector.shape_cast %47 : vector<1x8x4xf32> to vector<8x4xf32>
      %49 = vector.extract_strided_slice %34 {offsets = [0, 9], sizes = [4, 7], strides = [1, 1]} : vector<4x16xf32> to vector<4x7xf32>
      %cst_43 = arith.constant dense<0.000000e+00> : vector<8x7xf32>
      %50 = tpu.matmul %48, %49, %cst_43 {dimension_numbers = #tpu.dot_dimension_numbers<[1], [0], [0], [1], [0, 0, 1, 1], [], []>} : vector<8x4xf32>, vector<4x7xf32>, vector<8x7xf32> -> vector<8x7xf32>
      %51 = tpu.concatenate %38, %42, %46, %50 in 1 : vector<8x1xf32>, vector<8x3xf32>, vector<8x5xf32>, vector<8x7xf32> -> vector<8x16xf32>
      %52 = tpu.concatenate %51, %14, %13 in 1 : vector<8x16xf32>, vector<8x4xf32>, vector<8x4xf32> -> vector<8x24xf32>
      %53 = tpu.concatenate %33, %52 in 0 : vector<8x24xf32>, vector<8x24xf32> -> vector<16x24xf32>
      %c0_44 = arith.constant 0 : index
      %c0_45 = arith.constant 0 : index
      %54 = vector.load %arg5[%c0_44, %c0_45] : memref<16x24xf32, #tpu.memory_space<vmem>>, vector<16x24xf32>
      tpu.vector_store %arg5[%c0_44, %c0_45], %53 {strides = array<i32>} : memref<16x24xf32, #tpu.memory_space<vmem>>, vector<16x24xf32>,
    } else {
    }
    return
  }
  func.func @transform_0(%arg0: i32) -> (i32, i32) {
    %c0_i32 = arith.constant 0 : i32
    %c0_i32_0 = arith.constant 0 : i32
    return %c0_i32, %arg0 : i32, i32
  }
  func.func @transform_1(%arg0: i32) -> (i32, i32) {
    %c0_i32 = arith.constant 0 : i32
    %c0_i32_0 = arith.constant 0 : i32
    return %arg0, %c0_i32 : i32, i32
  }
  func.func @transform_2(%arg0: i32) -> (i32, i32, i32) {
    %c0_i32 = arith.constant 0 : i32
    %c0_i32_0 = arith.constant 0 : i32
    %c0_i32_1 = arith.constant 0 : i32
    %c0_i32_2 = arith.constant 0 : i32
    return %c0_i32, %c0_i32_0, %c0_i32_1 : i32, i32, i32
  }
  func.func @transform_3(%arg0: i32) -> (i32, i32) {
    %c0_i32 = arith.constant 0 : i32
    %c0_i32_0 = arith.constant 0 : i32
    %c0_i32_1 = arith.constant 0 : i32
    return %c0_i32, %c0_i32_0 : i32, i32
  }
  func.func @transform_4(%arg0: i32) -> (i32, i32) {
    %c0_i32 = arith.constant 0 : i32
    %c0_i32_0 = arith.constant 0 : i32
    %c0_i32_1 = arith.constant 0 : i32
    return %c0_i32, %c0_i32_0 : i32, i32
  }
}

module attributes {stable_mosaic.version = 11 : i64} {
  func.func @_bn_apply_kernel(%arg0: i32, %arg1: memref<16x128xf32, #tpu.memory_space<vmem>>, %arg2: memref<16x1xf32, #tpu.memory_space<vmem>>, %arg3: memref<16x1xf32, #tpu.memory_space<vmem>>, %arg4: memref<16x128xf32, #tpu.memory_space<vmem>>) attributes {dimension_semantics = [#tpu.dimension_semantics<parallel>], iteration_bounds = array<i64: 1>, scalar_prefetch = 0 : i64, scratch_operands = 0 : i64, tpu.core_type = #tpu.core_type<tc>, window_params = [{transform_indices = @transform_0, window_bounds = array<i64: 16, 128>}, {pipeline_mode = #tpu.pipeline_mode<synchronous>, transform_indices = @transform_1, window_bounds = array<i64: 16, 1>}, {pipeline_mode = #tpu.pipeline_mode<synchronous>, transform_indices = @transform_2, window_bounds = array<i64: 16, 1>}, {transform_indices = @transform_3, window_bounds = array<i64: 16, 128>}]} {
    %c0 = arith.constant 0 : index
    %c0_0 = arith.constant 0 : index
    %0 = vector.load %arg1[%c0, %c0_0] : memref<16x128xf32, #tpu.memory_space<vmem>>, vector<16x128xf32>
    %c0_1 = arith.constant 0 : index
    %c0_2 = arith.constant 0 : index
    %1 = vector.load %arg2[%c0_1, %c0_2] : memref<16x1xf32, #tpu.memory_space<vmem>>, vector<16x1xf32>
    %2 = vector.broadcast %1 : vector<16x1xf32> to vector<16x128xf32>
    %3 = arith.mulf %0, %2 : vector<16x128xf32>
    %c0_3 = arith.constant 0 : index
    %c0_4 = arith.constant 0 : index
    %4 = vector.load %arg3[%c0_3, %c0_4] : memref<16x1xf32, #tpu.memory_space<vmem>>, vector<16x1xf32>
    %5 = vector.broadcast %4 : vector<16x1xf32> to vector<16x128xf32>
    %6 = arith.addf %3, %5 : vector<16x128xf32>
    %c0_5 = arith.constant 0 : index
    %c0_6 = arith.constant 0 : index
    %7 = vector.load %arg4[%c0_5, %c0_6] : memref<16x128xf32, #tpu.memory_space<vmem>>, vector<16x128xf32>
    tpu.vector_store %arg4[%c0_5, %c0_6], %6 {strides = array<i32>} : memref<16x128xf32, #tpu.memory_space<vmem>>, vector<16x128xf32>,
    return
  }
  func.func @transform_0(%arg0: i32) -> (i32, i32) {
    %c0_i32 = arith.constant 0 : i32
    %c0_i32_0 = arith.constant 0 : i32
    return %c0_i32, %arg0 : i32, i32
  }
  func.func @transform_1(%arg0: i32) -> (i32, i32) {
    %c0_i32 = arith.constant 0 : i32
    %c0_i32_0 = arith.constant 0 : i32
    %c0_i32_1 = arith.constant 0 : i32
    return %c0_i32, %c0_i32_0 : i32, i32
  }
  func.func @transform_2(%arg0: i32) -> (i32, i32) {
    %c0_i32 = arith.constant 0 : i32
    %c0_i32_0 = arith.constant 0 : i32
    %c0_i32_1 = arith.constant 0 : i32
    return %c0_i32, %c0_i32_0 : i32, i32
  }
  func.func @transform_3(%arg0: i32) -> (i32, i32) {
    %c0_i32 = arith.constant 0 : i32
    %c0_i32_0 = arith.constant 0 : i32
    return %c0_i32, %arg0 : i32, i32
  }
}

</mosaic_0001>

<bundles_post_ra>
// kernel: tile.18
= control target key start
LH: loop header
LB: loop body
LE: loop exit
PB: predicated region body
PF: predicated region fallthrough
CT: control target
= control target key end

     0   :  { %s22_s0 = inlined_call_operand.vmem [shape: f32[8], index: 0, kind: input, shape index: {}]   ;;  %s23_s1 = inlined_call_operand.vmem [shape: f32[2,8], index: 1, kind: output, shape index: {}]  }
   0x1   :  { %v4_v0 = vld [vmem:[%s22_s0] ss:$0 sm:$0xff] }
   0x2   :  { %5 = vst [vmem:[%s23_s1] sm:$0x3] %v4_v0 }

// kernel: tile.0
= control target key start
LH: loop header
LB: loop body
LE: loop exit
PB: predicated region body
PF: predicated region fallthrough
CT: control target
= control target key end

     0   :  { %s67_s8 = smov 125   ;;  %vm8_vm0 = vcmask 7168   ;;  %s68_s11 = smov 126   ;;  %s118_s0 = inlined_call_operand.vmem [shape: f32[2,8], index: 0, kind: input, shape index: {}]   ;;  %s119_s1 = inlined_call_operand.vmem [shape: f32[16,1], index: 1, kind: output, shape index: {}]  }
   0x1   :  { %v5_v0 = vld [vmem:[%s118_s0] sm:$0x3]  ;;  %s66_s0 = smov 127   ;;  %s69_s12 = smov 124  }
   0x2   :  { %6 = vst [vmem:[#allocation0] sm:$0x3] %v5_v0  ;;  %s70_s13 = smov 123   ;;  %s71_s14 = smov 122  }
   0x3   :  { %s72_s15 = smov 121  }
   0x9   :  { %v10_v1 = vld [vmem:[#allocation0] sm:$0x3]  }
   0xa   :  { %v22_v2 = vld [vmem:[#allocation0] sm:$0x3]   ;;  %11 = vrot.lane.b32.xlu0 %v10_v1, %s66_s0 }
   0xb   :  { %23 = vrot.lane.b32.xlu1 %v22_v2, %s67_s8  ;;  %v16_v3 = vld [vmem:[#allocation0] sm:$0x3]  }
   0xc   :  { %v28_v4 = vld [vmem:[#allocation0] sm:$0x3]  }
   0xd   :  { %v7_v5 = vld [vmem:[#allocation0] sm:$0x3]  }
   0xe   :  { %9 = vst.msk [vmem:[%s119_s1] ss:$8 sm:$0x3] %vm8_vm0, %v7_v5   ;;  %17 = vrot.lane.b32.xlu0 %v16_v3, %s68_s11  ;;  %v34_v6 = vld [vmem:[#allocation0] sm:$0x3]  }
   0xf   :  { %29 = vrot.lane.b32.xlu1 %v28_v4, %s69_s12  ;;  %v40_v7 = vld [vmem:[#allocation0] sm:$0x3]  }
  0x10   :  { %v46_v8 = vld [vmem:[#allocation0] sm:$0x3]  }
  0x12   :  { %35 = vrot.lane.b32.xlu0 %v34_v6, %s70_s13 }
  0x13   :  { %41 = vrot.lane.b32.xlu1 %v40_v7, %s71_s14 }
  0x16   :  { %47 = vrot.lane.b32.xlu0 %v46_v8, %s72_s15 }
  0x7c   :  { %v12_v9 = vpop.permute.xlu0 %11  }
  0x7d   :  { %v24_v10 = vpop.permute.xlu1 %23   ;;  %52 = vst.msk [vmem:[%s119_s1 + $0x1] ss:$8 sm:$0x3] %vm8_vm0, %v12_v9  }
  0x7e   :  { %54 = vst.msk [vmem:[%s119_s1 + $0x3] ss:$8 sm:$0x3] %vm8_vm0, %v24_v10  }
  0x80   :  { %v18_v11 = vpop.permute.xlu0 %17  }
  0x81   :  { %v30_v12 = vpop.permute.xlu1 %29   ;;  %53 = vst.msk [vmem:[%s119_s1 + $0x2] ss:$8 sm:$0x3] %vm8_vm0, %v18_v11  }
  0x82   :  { %55 = vst.msk [vmem:[%s119_s1 + $0x4] ss:$8 sm:$0x3] %vm8_vm0, %v30_v12  }
  0x84   :  { %v36_v13 = vpop.permute.xlu0 %35  }
  0x85   :  { %v42_v14 = vpop.permute.xlu1 %41   ;;  %56 = vst.msk [vmem:[%s119_s1 + $0x5] ss:$8 sm:$0x3] %vm8_vm0, %v36_v13  }
  0x86   :  { %57 = vst.msk [vmem:[%s119_s1 + $0x6] ss:$8 sm:$0x3] %vm8_vm0, %v42_v14  }
  0x88   :  { %v48_v15 = vpop.permute.xlu0 %47  }
  0x89   :  { %58 = vst.msk [vmem:[%s119_s1 + $0x7] ss:$8 sm:$0x3] %vm8_vm0, %v48_v15  }

// kernel: final_forward.4
= control target key start
LH: loop header
LB: loop body
LE: loop exit
PB: predicated region body
PF: predicated region fallthrough
CT: control target
= control target key end

     0   :  { %vm107_vm0 = vcmask 130048   ;;  %s237_s19 = smov 112   ;;  %vm27_vm1 = vcmask 64512   ;;  %vm199_vm2 = vcmask 7168   ;;  %vm202_vm3 = vcmask 15360   ;;  %s292_s0 = inlined_call_operand.vmem [shape: f32[16,24], index: 0, kind: input, shape index: {}]   ;;  %s293_s1 = inlined_call_operand.vmem [shape: f32[16,128], index: 1, kind: input, shape index: {}]   ;;  %s294_s2 = inlined_call_operand.vmem [shape: f32[8,128], index: 2, kind: input, shape index: {}]   ;;  %s295_s3 = inlined_call_operand.vmem [shape: f32[16,128], index: 3, kind: output, shape index: {0}]   ;;  %s296_s4 = inlined_call_operand.vmem [shape: f32[1,16,2], index: 4, kind: output, shape index: {1}]  }
   0x1   :  { %v16_v0 = vld [vmem:[%s292_s0] sm:$0xff]  ;;  %v19_v1 = vld [vmem:[%s293_s1 + $0x8] sm:$0xff] }
   0x2   :  { %23 = vrot.lane.b32.xlu0 %v16_v0, %s237_s19  ;;  %229 = vmatprep.subr.mxu1 %v19_v1  ;;  %v18_v2 = vld [vmem:[%s293_s1] sm:$0xff]  ;;  %v17_v4 = vld [vmem:[%s292_s0 + $0x8] sm:$0xff] }
   0x3   :  { %v20_v3 = vld [vmem:[%s294_s2] sm:$0xff]  ;;  %230 = vmatpush3.msra.mxu1 %v19_v1  ;;  %233 = vmatprep.mubr.msk.f32.mxu1 %vm107_vm0, %v16_v0 }
   0x4   :  { %231 = vmatprep.subr.mxu1 %v18_v2  ;;  %224 = vmatprep.subr.mxu0 %v20_v3 }
   0x5   :  { %232 = vmatpush3.msra.mxu1 %v18_v2  ;;  %225 = vmatpush3.msra.mxu0 %v20_v3 }
   0x6   :  { %25 = vrot.lane.b32.xlu0 %v17_v4, %s237_s19  ;;  %234 = vmatmul.mubr.msk.f32.vlgmr.msra.gmra.mxu1 %vm107_vm0, %v17_v4 }
  0x74   :  { %v24_v5 = vpop.permute.xlu0 %23 }
  0x75   :  { %226 = vmatprep.mubr.msk.f32.mxu0 %vm27_vm1, %v24_v5 }
  0x78   :  { %v26_v6 = vpop.permute.xlu0 %25 }
  0x79   :  { %227 = vmatmul.mubr.msk.f32.vlgmr.msra.gmra.mxu0 %vm27_vm1, %v26_v6 }
  0xc6   :  { %v235_v7 = vpop.f32.mrf.mxu1 }
  0xc8   :  { %v178_v10 = vpop.f32.mrf.mxu1 }
 0x139   :  { %v228_v8 = vpop.f32.mrf.mxu0 }
 0x13a   :  { %v184_v9 = vadd.f32 %v235_v7, %v228_v8 }
 0x13b   :  { %v98_v11 = vpop.f32.mrf.mxu0 }
 0x13c   :  { %188 = vst [vmem:[%s295_s3 + $0x8] sm:$0xff] %v184_v9  ;;  %v179_v12 = vadd.f32 %v178_v10, %v98_v11  ;;  %191 = vadd.xlane.f32.xlu1 %v184_v9  ;;  %v194_v14 = vmul.f32 %v184_v9, %v184_v9 }
 0x13e   :  { %187 = vst [vmem:[%s295_s3] sm:$0xff] %v179_v12  ;;  %v193_v13 = vmul.f32 %v179_v12, %v179_v12 }
 0x140   :  { %189 = vadd.xlane.f32.xlu1 %v179_v12  ;;  %195 = vadd.xlane.f32.xlu0 %v193_v13 }
 0x144   :  { %197 = vadd.xlane.f32.xlu1 %v194_v14 }
 0x1c5   :  { %v192_v15 = vpop.xlane.xlu1 %191 }
 0x1c9   :  { %v190_v16 = vpop.xlane.xlu1 %189  ;;  %v196_v17 = vpop.xlane.xlu0 %195 }
 0x1ca   :  { %v200_v18 = vsel %vm199_vm2, %v190_v16, %v196_v17 }
 0x1cb   :  { %203 = vst.msk [vmem:[%s296_s4] sm:$0xff] %vm202_vm3, %v200_v18 }
 0x1cd   :  { %v198_v19 = vpop.xlane.xlu1 %197 }
 0x1ce   :  { %v201_v20 = vsel %vm199_vm2, %v192_v15, %v198_v19 }
 0x1cf   :  { %204 = vst.msk [vmem:[%s296_s4 + $0x8] sm:$0xff] %vm202_vm3, %v201_v20 }

// kernel: final_forward.5
= control target key start
LH: loop header
LB: loop body
LE: loop exit
PB: predicated region body
PF: predicated region fallthrough
CT: control target
= control target key end

     0   :  { %v91_v2 = vmov 0   ;;  %s136_s0 = inlined_call_operand.vmem [shape: f32[16,128], index: 0, kind: input, shape index: {}]   ;;  %s137_s1 = inlined_call_operand.vmem [shape: f32[16,1], index: 1, kind: input, shape index: {}]   ;;  %s138_s2 = inlined_call_operand.vmem [shape: f32[16,1], index: 2, kind: input, shape index: {}]   ;;  %s139_s3 = inlined_call_operand.hbm [shape: f32[16,128], index: 3, kind: output, shape index: {}]  }
   0x1   :  { %v31_v0 = vld [vmem:[%s138_s2] sm:$0xff]  ;;  %68 = vset.pattern.permute.xlu1 %v91_v2  ;;  %67 = vset.pattern.permute.xlu0 %v91_v2 }
   0x2   :  { %v17_v1 = vld [vmem:[%s137_s1] sm:$0xff]  ;;  %35 = vperm.xlu1 %68, %v31_v0  }
   0x3   :  { %21 = vperm.xlu0 %67, %v17_v1  }
   0x4   :  { %8 = vsyncpa [#allocation3], 0  ;;  %v32_v3 = vld [vmem:[%s138_s2 + $0x8] sm:$0xff]  ;;  %v15_v5 = vld [vmem:[%s136_s0] sm:$0xff]  ;;  %s92_s24 = smov [#allocation2]  }
   0x5   :  { %v18_v4 = vld [vmem:[%s137_s1 + $0x8] sm:$0xff]  ;;  %s52_s2 = sshll.u32 %s92_s24, 4  ;;  %s53_s2 = int_to_ptr.vmem [resolvable:$true] %s52_s2 }
   0x6   :  { %40 = vperm.xlu1 %68, %v32_v3   ;;  %v16_v9 = vld [vmem:[%s136_s0 + $0x8] sm:$0xff]  ;;  %s69_s1 = scalar_lea.vmem %s53_s2, 256  ;;  %p74_p1 = scmp.lt.s32.totalorder %s53_s2, %s53_s2 }
   0x7   :  { %26 = vperm.xlu0 %67, %v18_v4   ;;  %p70_p0 = scmp.ne.s32.totalorder %s53_s2, %s69_s1  ;;  %p75_p2 = scmp.lt.s32.totalorder %s69_s1, %s69_s1 }
   0x9   :  { %p76_p3 = por %p75_p2, %p74_p1 }
   0xb   :  { %p77_p4 = pnand %p76_p3, %p70_p0 }
  0x7d   :  { %v36_v6 = vpop.permute.xlu1 %35 }
  0x7e   :  { %v22_v7 = vpop.permute.xlu0 %21 }
  0x7f   :  { %v29_v8 = vmul.f32 %v22_v7, %v15_v5 }
  0x81   :  { %v43_v10 = vadd.f32 %v36_v6, %v29_v8  ;;  %v41_v13 = vpop.permute.xlu1 %40 }
  0x82   :  { %v27_v11 = vpop.permute.xlu0 %26 }
  0x83   :  { %45 = vst [vmem:[#allocation2] sm:$0xff] %v43_v10  ;;  %v30_v12 = vmul.f32 %v27_v11, %v16_v9 }
  0x85   :  { %v44_v14 = vadd.f32 %v41_v13, %v30_v12 }
  0x87   :  { %46 = vst [vmem:[#allocation2 + $0x8] sm:$0xff] %v44_v14 }
  0x88   :  { %80 = shalt.err (!%p77_p4)
}
  0x89   :  { %s93_s25 = smov 128   ;;  %s94_s26 = smov 8  }
  0x8a   :  { %58 = dma.vmem_to_hbm [thread:$0]  %s53_s2, 256, %s139_s3, [#allocation3], %s93_s25, %s93_s25, %s94_s26  }
  0x8b   :  { %89 = dma.done.wait [#allocation3], 256  }
  0x8c   :  { %90 = vsyncadd [#allocation3], 4294967040 }
  0x8d   :  { %62 = vsyncpa [#allocation3], 1 }

// kernel: final_forward.3
= control target key start
LH: loop header
LB: loop body
LE: loop exit
PB: predicated region body
PF: predicated region fallthrough
CT: control target
= control target key end

     0   :  { %vm21_vm0 = vcmask 130048   ;;  %v918_v0 = vmov 0.0   ;;  %vm919_vm1 = vmmov 0   ;;  %vm124_vm2 = vcmask 1043456   ;;  %s922_s25 = smov 124   ;;  %s924_s6 = smov 4   ;;  %s1094_s1 = inlined_call_operand.vmem [shape: f32[128,16], index: 1, kind: input, shape index: {}]   ;;  %s1095_s0 = inlined_call_operand.vmem [shape: f32[8,128], index: 0, kind: input, shape index: {}]   ;;  %s1096_s2 = inlined_call_operand.vmem [shape: f32[4,8,4], index: 2, kind: input, shape index: {}]   ;;  %s1097_s3 = inlined_call_operand.vmem [shape: f32[8,4], index: 3, kind: input, shape index: {}]   ;;  %s1098_s4 = inlined_call_operand.vmem [shape: f32[16,24], index: 4, kind: output, shape index: {}]  }
   0x1   :  { %833 = vmatprep.subr.mxu0 %v918_v0  ;;  %v40_v1 = vld [vmem:[%s1094_s1 + $0x78] sm:$0xff]  ;;  %v39_v2 = vld [vmem:[%s1094_s1 + $0x70] sm:$0xff]  ;;  %865 = vmatprep.mubr.msk.f32.mxu0 %vm919_vm1, %v918_v0  ;;  %22 = vst.msk [vmem:[#allocation2] sm:$0xff] %vm21_vm0, %v918_v0  ;;  %v38_v3 = vld [vmem:[%s1094_s1 + $0x68] sm:$0xff]  ;;  %vm120_vm3 = vcmask 31744   ;;  %s925_s7 = smov 9  }
   0x2   :  { %834 = vmatpush3.msra.mxu0 %v40_v1  ;;  %868 = vmatprep.subr.mxu1 %v918_v0  ;;  %v37_v4 = vld [vmem:[%s1094_s1 + $0x60] sm:$0xff]  ;;  %v36_v5 = vld [vmem:[%s1094_s1 + $0x58] sm:$0xff]  ;;  %v35_v6 = vld [vmem:[%s1094_s1 + $0x50] sm:$0xff]  ;;  %s926_s10 = smov 16   ;;  %s927_s11 = smov 20   ;;  %vm447_vm4 = vcmask 7168  }
   0x3   :  { %835 = vmatprep.subr.mxu0 %v918_v0  ;;  %870 = vmatprep.mubr.msk.f32.mxu1 %vm919_vm1, %v918_v0  ;;  %v34_v7 = vld [vmem:[%s1094_s1 + $0x48] sm:$0xff]  ;;  %v33_v8 = vld [vmem:[%s1094_s1 + $0x40] sm:$0xff]  ;;  %v32_v9 = vld [vmem:[%s1094_s1 + $0x38] sm:$0xff]  ;;  %vm450_vm5 = vcmask 72704   ;;  %vm457_vm6 = vcmask 162816   ;;  %vm774_vm7 = vcmask 195584  }
   0x4   :  { %836 = vmatpush3.msra.mxu0 %v39_v2  ;;  %v31_v10 = vld [vmem:[%s1094_s1 + $0x30] sm:$0xff]  ;;  %v30_v11 = vld [vmem:[%s1094_s1 + $0x28] sm:$0xff]  ;;  %v29_v12 = vld [vmem:[%s1094_s1 + $0x20] sm:$0xff] }
   0x5   :  { %837 = vmatprep.subr.mxu0 %v918_v0  ;;  %v28_v13 = vld [vmem:[%s1094_s1 + $0x18] sm:$0xff]  ;;  %v27_v14 = vld [vmem:[%s1094_s1 + $0x10] sm:$0xff]  ;;  %v26_v15 = vld [vmem:[%s1094_s1 + $0x8] sm:$0xff] }
   0x6   :  { %838 = vmatpush3.msra.mxu0 %v38_v3  ;;  %v25_v16 = vld [vmem:[%s1094_s1] sm:$0xff]  ;;  %s920_s1 = smov 119   ;;  %v783_v25 = vld [vmem:[%s1096_s2 + $0x8] sm:$0xff]  ;;  %v786_v27 = vld [vmem:[%s1096_s2 + $0x10] sm:$0xff] }
   0x7   :  { %839 = vmatprep.subr.mxu0 %v918_v0  ;;  %v24_v17 = vld [vmem:[%s1095_s0] sm:$0xff]  ;;  %s921_s0 = smov 127   ;;  %v789_v30 = vld [vmem:[%s1096_s2 + $0x18] sm:$0xff] }
   0x8   :  { %840 = vmatpush3.msra.mxu0 %v37_v4  ;;  %v23_v18 = vld [vmem:[#allocation2] sm:$0xff] }
   0x9   :  { %841 = vmatprep.subr.mxu0 %v918_v0  ;;  %v119_v23 = vld [vmem:[%s1096_s2] sm:$0xff]  ;;  %s923_s2 = smov 1  }
   0xa   :  { %842 = vmatpush3.msra.mxu0 %v36_v5  ;;  %v118_v42 = vld [vmem:[%s1097_s3] sm:$0xff] }
   0xb   :  { %843 = vmatprep.subr.mxu0 %v918_v0 }
   0xc   :  { %844 = vmatpush3.msra.mxu0 %v35_v6 }
   0xd   :  { %845 = vmatprep.subr.mxu0 %v918_v0 }
   0xe   :  { %846 = vmatpush3.msra.mxu0 %v34_v7 }
   0xf   :  { %847 = vmatprep.subr.mxu0 %v918_v0 }
  0x10   :  { %848 = vmatpush3.msra.mxu0 %v33_v8 }
  0x11   :  { %849 = vmatprep.subr.mxu0 %v918_v0 }
  0x12   :  { %850 = vmatpush3.msra.mxu0 %v32_v9 }
  0x13   :  { %851 = vmatprep.subr.mxu0 %v918_v0 }
  0x14   :  { %852 = vmatpush3.msra.mxu0 %v31_v10 }
  0x15   :  { %853 = vmatprep.subr.mxu0 %v918_v0 }
  0x16   :  { %854 = vmatpush3.msra.mxu0 %v30_v11 }
  0x17   :  { %855 = vmatprep.subr.mxu0 %v918_v0 }
  0x18   :  { %856 = vmatpush3.msra.mxu0 %v29_v12 }
  0x19   :  { %857 = vmatprep.subr.mxu0 %v918_v0 }
  0x1a   :  { %858 = vmatpush3.msra.mxu0 %v28_v13 }
  0x1b   :  { %859 = vmatprep.subr.mxu0 %v918_v0 }
  0x1c   :  { %860 = vmatpush3.msra.mxu0 %v27_v14 }
  0x1d   :  { %861 = vmatprep.subr.mxu0 %v918_v0 }
  0x1e   :  { %862 = vmatpush3.msra.mxu0 %v26_v15 }
  0x1f   :  { %863 = vmatprep.subr.mxu0 %v918_v0 }
  0x20   :  { %864 = vmatpush3.msra.mxu0 %v25_v16 }
  0x21   :  { %866 = vmatmul.mubr.f32.vlgmr.msra.gmra.mxu0 %v24_v17 }
  0xe1   :  { %v107_v19 = vpop.f32.mrf.mxu0 }
  0xe2   :  { %v111_v20 = vadd.f32 %v107_v19, %v23_v18 }
  0xe3   :  { %v867_v21 = vpop.f32.mrf.mxu0 }
  0xe4   :  { %113 = vst.msk [vmem:[#allocation2] sm:$0xff] %vm21_vm0, %v111_v20 }
  0xeb   :  { %v117_v22 = vld [vmem:[#allocation2] sm:$0xff] }
  0xec   :  { %358 = vrot.lane.b32.xlu1 %v117_v22, %s920_s1  ;;  %200 = vrot.lane.b32.xlu0 %v117_v22, %s921_s0  ;;  %v459_v24 = vrot.slane %v117_v22, 4 }
  0xed   :  { %869 = vmatpush3.msk.msra.mxu1 %vm124_vm2, %v117_v22 }
  0xee   :  { %871 = vmatmul.mubr.msk.f32.vlgmr.msra.gmra.mxu1 %vm120_vm3, %v119_v23  ;;  %873 = vmatprep.subr.mxu1 %v918_v0 }
  0xef   :  { %875 = vmatprep.mubr.msk.f32.mxu1 %vm919_vm1, %v918_v0 }
  0xf0   :  { %279 = vrot.lane.b32.xlu0 %v117_v22, %s922_s25  ;;  %532 = vrot.lane.b32.xlu1 %v459_v24, %s921_s0 }
  0xf4   :  { %606 = vrot.lane.b32.xlu0 %v459_v24, %s922_s25  ;;  %680 = vrot.lane.b32.xlu1 %v459_v24, %s920_s1 }
 0x15e   :  { %v201_v26 = vpop.permute.xlu0 %200  ;;  %v359_v29 = vpop.permute.xlu1 %358 }
 0x15f   :  { %874 = vmatpush3.msk.msra.mxu1 %vm124_vm2, %v201_v26 }
 0x160   :  { %876 = vmatmul.mubr.msk.f32.vlgmr.msra.gmra.mxu1 %vm120_vm3, %v783_v25  ;;  %878 = vmatprep.subr.mxu1 %v918_v0 }
 0x161   :  { %880 = vmatprep.mubr.msk.f32.mxu1 %vm919_vm1, %v918_v0 }
 0x162   :  { %v280_v28 = vpop.permute.xlu0 %279  ;;  %v533_v31 = vpop.permute.xlu1 %532 }
 0x163   :  { %879 = vmatpush3.msk.msra.mxu1 %vm124_vm2, %v280_v28 }
 0x164   :  { %881 = vmatmul.mubr.msk.f32.vlgmr.msra.gmra.mxu1 %vm120_vm3, %v786_v27  ;;  %883 = vmatprep.subr.mxu1 %v918_v0 }
 0x165   :  { %884 = vmatpush3.msk.msra.mxu1 %vm124_vm2, %v359_v29  ;;  %885 = vmatprep.mubr.msk.f32.mxu1 %vm919_vm1, %v918_v0 }
 0x166   :  { %888 = vmatprep.subr.mxu1 %v918_v0  ;;  %v607_v32 = vpop.permute.xlu0 %606  ;;  %v681_v33 = vpop.permute.xlu1 %680 }
 0x168   :  { %886 = vmatmul.mubr.msk.f32.vlgmr.msra.gmra.mxu1 %vm120_vm3, %v789_v30 }
 0x169   :  { %889 = vmatpush3.msk.msra.mxu1 %vm124_vm2, %v459_v24  ;;  %890 = vmatprep.mubr.msk.f32.mxu1 %vm919_vm1, %v918_v0 }
 0x16a   :  { %893 = vmatprep.subr.mxu1 %v918_v0 }
 0x16c   :  { %891 = vmatmul.mubr.msk.f32.vlgmr.msra.gmra.mxu1 %vm120_vm3, %v119_v23 }
 0x16d   :  { %894 = vmatpush3.msk.msra.mxu1 %vm124_vm2, %v533_v31  ;;  %895 = vmatprep.mubr.msk.f32.mxu1 %vm919_vm1, %v918_v0 }
 0x16e   :  { %898 = vmatprep.subr.mxu1 %v918_v0 }
 0x170   :  { %896 = vmatmul.mubr.msk.f32.vlgmr.msra.gmra.mxu1 %vm120_vm3, %v783_v25 }
 0x171   :  { %899 = vmatpush3.msk.msra.mxu1 %vm124_vm2, %v607_v32  ;;  %900 = vmatprep.mubr.msk.f32.mxu1 %vm919_vm1, %v918_v0 }
 0x172   :  { %903 = vmatprep.subr.mxu1 %v918_v0 }
 0x174   :  { %901 = vmatmul.mubr.msk.f32.vlgmr.msra.gmra.mxu1 %vm120_vm3, %v786_v27 }
 0x175   :  { %904 = vmatpush3.msk.msra.mxu1 %vm124_vm2, %v681_v33  ;;  %905 = vmatprep.mubr.msk.f32.mxu1 %vm919_vm1, %v918_v0 }
 0x178   :  { %906 = vmatmul.mubr.msk.f32.vlgmr.msra.gmra.mxu1 %vm120_vm3, %v789_v30 }
 0x1ae   :  { %v194_v34 = vpop.f32.mrf.mxu1 }
 0x1b0   :  { %v872_v35 = vpop.f32.mrf.mxu1 }
 0x220   :  { %v273_v36 = vpop.f32.mrf.mxu1 }
 0x221   :  { %436 = vrot.lane.b32.xlu0 %v273_v36, %s923_s2 }
 0x222   :  { %v877_v37 = vpop.f32.mrf.mxu1 }
 0x224   :  { %v352_v38 = vpop.f32.mrf.mxu1 }
 0x225   :  { %440 = vrot.lane.b32.xlu0 %v352_v38, %s924_s6 }
 0x226   :  { %v882_v39 = vpop.f32.mrf.mxu1 }
 0x228   :  { %v431_v40 = vpop.f32.mrf.mxu1 }
 0x229   :  { %444 = vrot.lane.b32.xlu0 %v431_v40, %s925_s7 }
 0x22a   :  { %v887_v41 = vpop.f32.mrf.mxu1 }
 0x22c   :  { %v528_v43 = vpop.f32.mrf.mxu1 }
 0x22d   :  { %453 = vrot.lane.b32.xlu0 %v118_v42, %s926_s10 }
 0x22e   :  { %v892_v44 = vpop.f32.mrf.mxu1 }
 0x230   :  { %v602_v45 = vpop.f32.mrf.mxu1 }
 0x231   :  { %755 = vrot.lane.b32.xlu1 %v602_v45, %s923_s2 }
 0x232   :  { %v897_v46 = vpop.f32.mrf.mxu1 }
 0x234   :  { %v676_v47 = vpop.f32.mrf.mxu1 }
 0x235   :  { %759 = vrot.lane.b32.xlu1 %v676_v47, %s924_s6 }
 0x236   :  { %v902_v48 = vpop.f32.mrf.mxu1 }
 0x238   :  { %v750_v49 = vpop.f32.mrf.mxu1 }
 0x239   :  { %763 = vrot.lane.b32.xlu1 %v750_v49, %s925_s7 }
 0x23a   :  { %v907_v50 = vpop.f32.mrf.mxu1 }
 0x23d   :  { %769 = vrot.lane.b32.xlu1 %v118_v42, %s927_s11 }
 0x293   :  { %v437_v51 = vpop.permute.xlu0 %436 }
 0x294   :  { %v448_v54 = vsel %vm447_vm4, %v194_v34, %v437_v51 }
 0x297   :  { %v441_v52 = vpop.permute.xlu0 %440 }
 0x298   :  { %v449_v55 = vsel %vm120_vm3, %v448_v54, %v441_v52 }
 0x29b   :  { %v445_v53 = vpop.permute.xlu0 %444 }
 0x29c   :  { %v451_v56 = vsel %vm450_vm5, %v449_v55, %v445_v53 }
 0x29f   :  { %v454_v57 = vpop.permute.xlu0 %453 }
 0x2a0   :  { %v456_v58 = vsel %vm21_vm0, %v451_v56, %v454_v57 }
 0x2a1   :  { %v458_v59 = vsel %vm457_vm6, %v456_v58, 0.0 }
 0x2a2   :  { %775 = vst.msk [vmem:[%s1098_s4] sm:$0xff] %vm774_vm7, %v458_v59 }
 0x2a3   :  { %v756_v60 = vpop.permute.xlu1 %755 }
 0x2a4   :  { %v766_v62 = vsel %vm447_vm4, %v528_v43, %v756_v60 }
 0x2a7   :  { %v760_v61 = vpop.permute.xlu1 %759 }
 0x2a8   :  { %v767_v63 = vsel %vm120_vm3, %v766_v62, %v760_v61 }
 0x2ab   :  { %v764_v0 = vpop.permute.xlu1 %763 }
 0x2ac   :  { %v768_v1 = vsel %vm450_vm5, %v767_v63, %v764_v0 }
 0x2ad   :  { %v772_v2 = vsel %vm21_vm0, %v768_v1, 0.0 }
 0x2af   :  { %v770_v3 = vpop.permute.xlu1 %769 }
 0x2b0   :  { %v773_v4 = vsel %vm457_vm6, %v772_v2, %v770_v3 }
 0x2b1   :  { %776 = vst.msk [vmem:[%s1098_s4 + $0x8] sm:$0xff] %vm774_vm7, %v773_v4 }

</bundles_post_ra>
